<compile_context>
chip_gen: v5e
topology: v5e:2x2
jax: 0.10.0
libtpu: 0.0.40
codegen_flags: <defaults>
</compile_context>

<pallas_src>
import jax
import jax.numpy as jnp
from jax import lax
from jax.experimental import pallas as pl
from jax.experimental.pallas import tpu as pltpu


def attn_net_kernel(x_ref, w1_ref, b1_ref, w2t_ref, b2_ref, out_ref):
    # Cast x to bf16 in-kernel (VPU cast hides under the tile DMA); MXU matmul, f32 accumulate.
    x_bf16 = x_ref[...].astype(jnp.bfloat16)                 # [tile_n, L]
    h = jnp.dot(x_bf16, w1_ref[...], preferred_element_type=jnp.float32)
    a = jnp.tanh(h + b1_ref[...])                             # [tile_n, D] f32 (EUP tanh)
    # Second linear, transposed so the output lane axis is tile_n (lane-dense store):
    #   out_t[c, n] = sum_d w2t[c, d] * a[n, d]   -- bf16 MXU operands, f32 accumulate.
    out_t = lax.dot_general(
        w2t_ref[...], a.astype(jnp.bfloat16),
        dimension_numbers=(((1,), (1,)), ((), ())),
        preferred_element_type=jnp.float32)                   # [C, tile_n]
    out_ref[...] = (out_t + b2_ref[...]).astype(out_ref.dtype)


def attn_net_forward(x, w1, b1, w2t, b2, *, tile_n=1024):
    """AttnNet forward. Returns (scores [N, C], x) exactly like the PyTorch module.

    x:   [N, L]   streamed in its native dtype (f32 or bf16); cast to bf16 inside the kernel
    w1:  [L, D]   (nn.Linear(L, D).weight transposed)
    b1:  [D]
    w2t: [C, D]   (nn.Linear(D, C).weight, PyTorch layout)
    b2:  [C]
    """
    N, L = x.shape
    D = w1.shape[1]
    C = w2t.shape[0]

    # Shrink tile_n (multiple of 128) for small N so the grid has >= 2 steps (megacore on v7x).
    half_rounded = max(128, ((N + 1) // 2 + 127) // 128 * 128)
    tile_n = max(128, min(tile_n, half_rounded))
    grid_n = pl.cdiv(N, tile_n)

    # Weights are tiny relative to x; cast them once in the wrapper.
    w1_bf16 = w1.astype(jnp.bfloat16)
    w2t_bf16 = w2t.astype(jnp.bfloat16)
    b1_2d = b1.reshape(1, D).astype(jnp.float32)
    b2_2d = b2.reshape(C, 1).astype(jnp.float32)

    cost = pl.CostEstimate(
        flops=2 * N * L * D + 2 * N * D * C,
        transcendentals=N * D,
        bytes_accessed=(N * L * x.dtype.itemsize + L * D * 2 + D * C * 2
                        + D * 4 + C * 4 + N * C * 4),
    )

    out_t = pl.pallas_call(
        attn_net_kernel,
        out_shape=jax.ShapeDtypeStruct((C, N), x.dtype),
        grid=(grid_n,),
        in_specs=[
            pl.BlockSpec((tile_n, L), lambda i: (i, 0)),   # streamed x tiles (ragged last block OK)
            pl.BlockSpec((L, D), lambda i: (0, 0)),        # weights stay VMEM-resident
            pl.BlockSpec((1, D), lambda i: (0, 0)),
            pl.BlockSpec((C, D), lambda i: (0, 0)),
            pl.BlockSpec((C, 1), lambda i: (0, 0)),
        ],
        out_specs=pl.BlockSpec((C, tile_n), lambda i: (0, i)),  # lane-dense output tiles
        compiler_params=pltpu.CompilerParams(
            dimension_semantics=("parallel",),             # megacore on v7x
        ),
        cost_estimate=cost,
    )(x, w1_bf16, b1_2d, w2t_bf16, b2_2d)

    scores = out_t.T                                       # (C, N) -> (N, C), no padding to strip
    return scores, x


def init_params(key, L, D, n_classes, dtype=jnp.float32):
    """Deterministic synthetic init mimicking nn.Linear (uniform(-1/sqrt(fan_in), +))."""
    k1, k2, k3, k4 = jax.random.split(key, 4)
    lim1 = 1.0 / (L ** 0.5)
    lim2 = 1.0 / (D ** 0.5)
    w1 = jax.random.uniform(k1, (L, D), dtype, minval=-lim1, maxval=lim1)            # [L, D]
    b1 = jax.random.uniform(k2, (D,), dtype, minval=-lim1, maxval=lim1)              # [D]
    w2t = jax.random.uniform(k3, (n_classes, D), dtype, minval=-lim2, maxval=lim2)   # [C, D]
    b2 = jax.random.uniform(k4, (n_classes,), dtype, minval=-lim2, maxval=lim2)      # [C]
    return w1, b1, w2t, b2


if __name__ == "__main__":
    # Small (but lane-friendly) shapes consistent with the module: x is [N, L].
    # N is deliberately NOT a multiple of 128 to exercise the ragged-final-block path,
    # and large enough that the auto-chosen tile_n gives a 2-step grid (megacore path).
    N, L, D, n_classes = 300, 256, 128, 1

    key = jax.random.PRNGKey(0)
    kx, kp = jax.random.split(key)
    x = jax.random.normal(kx, (N, L), jnp.float32)
    w1, b1, w2t, b2 = init_params(kp, L, D, n_classes)

    scores, x_out = attn_net_forward(x, w1, b1, w2t, b2)
    jax.block_until_ready((scores, x_out))

    # Reference in plain f32 JAX (kernel uses bf16 MXU operands -> looser tolerance).
    ref = jnp.tanh(x @ w1 + b1[None, :]) @ w2t.T + b2[None, :]
    assert scores.shape == (N, n_classes), scores.shape
    assert jnp.allclose(scores, ref, atol=3e-2, rtol=3e-2), float(
        jnp.max(jnp.abs(scores - ref)))
    assert jnp.array_equal(x_out, x)

    print("KERNEL_OK")
</pallas_src>

<mosaic_0001>
module attributes {stable_mosaic.version = 11 : i64} {
  func.func @attn_net_kernel(%arg0: i32, %arg1: memref<256x256xf32, #tpu.memory_space<vmem>>, %arg2: memref<256x128xbf16, #tpu.memory_space<vmem>>, %arg3: memref<1x128xf32, #tpu.memory_space<vmem>>, %arg4: memref<1x128xbf16, #tpu.memory_space<vmem>>, %arg5: memref<1x1xf32, #tpu.memory_space<vmem>>, %arg6: memref<1x256xf32, #tpu.memory_space<vmem>>) attributes {dimension_semantics = [#tpu.dimension_semantics<parallel>], iteration_bounds = array<i64: 2>, scalar_prefetch = 0 : i64, scratch_operands = 0 : i64, tpu.core_type = #tpu.core_type<tc>, window_params = [{transform_indices = @transform_0, window_bounds = array<i64: 256, 256>}, {pipeline_mode = #tpu.pipeline_mode<synchronous>, transform_indices = @transform_1, window_bounds = array<i64: 256, 128>}, {pipeline_mode = #tpu.pipeline_mode<synchronous>, transform_indices = @transform_2, window_bounds = array<i64: 1, 128>}, {pipeline_mode = #tpu.pipeline_mode<synchronous>, transform_indices = @transform_3, window_bounds = array<i64: 1, 128>}, {pipeline_mode = #tpu.pipeline_mode<synchronous>, transform_indices = @transform_4, window_bounds = array<i64: 1, 1>}, {transform_indices = @transform_5, window_bounds = array<i64: 1, 256>}]} {
    %c0 = arith.constant 0 : index
    %c0_0 = arith.constant 0 : index
    %0 = vector.load %arg1[%c0, %c0_0] : memref<256x256xf32, #tpu.memory_space<vmem>>, vector<256x256xf32>
    %1 = arith.truncf %0 : vector<256x256xf32> to vector<256x256xbf16>
    %c0_1 = arith.constant 0 : index
    %c0_2 = arith.constant 0 : index
    %2 = vector.load %arg2[%c0_1, %c0_2] : memref<256x128xbf16, #tpu.memory_space<vmem>>, vector<256x128xbf16>
    %cst = arith.constant dense<0.000000e+00> : vector<256x128xf32>
    %3 = tpu.matmul %1, %2, %cst {dimension_numbers = #tpu.dot_dimension_numbers<[1], [0], [0], [1], [0, 0, 1, 1], [], []>} : vector<256x256xbf16>, vector<256x128xbf16>, vector<256x128xf32> -> vector<256x128xf32>
    %c0_3 = arith.constant 0 : index
    %c0_4 = arith.constant 0 : index
    %4 = vector.load %arg3[%c0_3, %c0_4] : memref<1x128xf32, #tpu.memory_space<vmem>>, vector<1x128xf32>
    %5 = vector.broadcast %4 : vector<1x128xf32> to vector<256x128xf32>
    %6 = arith.addf %3, %5 : vector<256x128xf32>
    %7 = math.tanh %6 : vector<256x128xf32>
    %c0_5 = arith.constant 0 : index
    %c0_6 = arith.constant 0 : index
    %8 = vector.load %arg4[%c0_5, %c0_6] : memref<1x128xbf16, #tpu.memory_space<vmem>>, vector<1x128xbf16>
    %9 = arith.truncf %7 : vector<256x128xf32> to vector<256x128xbf16>
    %cst_7 = arith.constant dense<0.000000e+00> : vector<1x256xf32>
    %10 = tpu.matmul %8, %9, %cst_7 {dimension_numbers = #tpu.dot_dimension_numbers<[1], [1], [0], [0], [0, 0, 1, 0], [], []>} : vector<1x128xbf16>, vector<256x128xbf16>, vector<1x256xf32> -> vector<1x256xf32>
    %c0_8 = arith.constant 0 : index
    %c0_9 = arith.constant 0 : index
    %11 = vector.load %arg5[%c0_8, %c0_9] : memref<1x1xf32, #tpu.memory_space<vmem>>, vector<1x1xf32>
    %12 = vector.broadcast %11 : vector<1x1xf32> to vector<1x256xf32>
    %13 = arith.addf %10, %12 : vector<1x256xf32>
    %c0_10 = arith.constant 0 : index
    %c0_11 = arith.constant 0 : index
    %14 = vector.load %arg6[%c0_10, %c0_11] : memref<1x256xf32, #tpu.memory_space<vmem>>, vector<1x256xf32>
    tpu.vector_store %arg6[%c0_10, %c0_11], %13 {strides = array<i32>} : memref<1x256xf32, #tpu.memory_space<vmem>>, vector<1x256xf32>,
    return
  }
  func.func @transform_0(%arg0: i32) -> (i32, i32) {
    %c0_i32 = arith.constant 0 : i32
    %c0_i32_0 = arith.constant 0 : i32
    return %arg0, %c0_i32 : i32, i32
  }
  func.func @transform_1(%arg0: i32) -> (i32, i32) {
    %c0_i32 = arith.constant 0 : i32
    %c0_i32_0 = arith.constant 0 : i32
    %c0_i32_1 = arith.constant 0 : i32
    return %c0_i32, %c0_i32_0 : i32, i32
  }
  func.func @transform_2(%arg0: i32) -> (i32, i32) {
    %c0_i32 = arith.constant 0 : i32
    %c0_i32_0 = arith.constant 0 : i32
    %c0_i32_1 = arith.constant 0 : i32
    return %c0_i32, %c0_i32_0 : i32, i32
  }
  func.func @transform_3(%arg0: i32) -> (i32, i32) {
    %c0_i32 = arith.constant 0 : i32
    %c0_i32_0 = arith.constant 0 : i32
    %c0_i32_1 = arith.constant 0 : i32
    return %c0_i32, %c0_i32_0 : i32, i32
  }
  func.func @transform_4(%arg0: i32) -> (i32, i32) {
    %c0_i32 = arith.constant 0 : i32
    %c0_i32_0 = arith.constant 0 : i32
    %c0_i32_1 = arith.constant 0 : i32
    return %c0_i32, %c0_i32_0 : i32, i32
  }
  func.func @transform_5(%arg0: i32) -> (i32, i32) {
    %c0_i32 = arith.constant 0 : i32
    %c0_i32_0 = arith.constant 0 : i32
    return %c0_i32, %arg0 : i32, i32
  }
}

</mosaic_0001>

<bundles_post_ra>
// kernel: tpu_custom_call.1
= control target key start
LH: loop header
LB: loop body
LE: loop exit
PB: predicated region body
PF: predicated region fallthrough
CT: control target
= control target key end

     0   :  { %s1702_s0 = inlined_call_operand.hbm [shape: f32[300,256], index: 0, kind: input, shape index: {}]   ;;  %s1703_s1 = inlined_call_operand.hbm [shape: bf16[256,128], index: 1, kind: input, shape index: {}]   ;;  %s1704_s2 = inlined_call_operand.vmem [shape: f32[1,128], index: 2, kind: input, shape index: {}]   ;;  %s1705_s3 = inlined_call_operand.vmem [shape: bf16[1,128], index: 3, kind: input, shape index: {}]   ;;  %s1706_s4 = inlined_call_operand.<no memory space> [shape: f32[1,1], index: 4, kind: input, shape index: {}]   ;;  %s1707_s5 = inlined_call_operand.hbm [shape: f32[1,300], index: 5, kind: output, shape index: {}]  }
   0x1   :  { %v10_v0 = vstv %s1706_s4 }
   0x2   :  { %11 = vst [vmem:[#allocation2] sm:$0x1] %v10_v0 }
   0x3   :  { %12 = vsyncpa [#allocation4], 0 }
   0x4   :  { %14 = vsyncpa [#allocation4 + $0x1], 0 }
   0x5   :  { %15 = vsyncpa [#allocation7], 0 }
   0x6   :  { %16 = vsyncpa [#allocation5], 0 }
   0x7   :  { %18 = vsyncpa [#allocation5 + $0x1], 0  ;;  %s1318_s20 = smov 0   ;;  %s1320_s21 = smov 0  }
   0x8   :  { %s1322_s22 = smov 0   ;;  %s1324_s23 = smov 0  }
   0x9 LB: > { %s1339_s4 = sadd.s32 4294967295, %s1275_s23   ;;  %s883_s24 = sadd.s32 4294967294, %s1275_s23   ;;  %s1275_s23 = sphi %s1324_s23, %s1725_s23   ;;  %s1271_s22 = sphi %s1322_s22, %s1724_s22   ;;  %s1267_s21 = sphi %s1320_s21, %s1723_s21   ;;  %s1263_s20 = sphi %s1318_s20, %s1722_s20  }
   0xa   : > { %s1343_s25 = sadd.s32 1, %s1275_s23   ;;  %s31_s26 = sadd.s32 1, %s1271_s22 }
   0xb   : > { %s28_s27 = ssub.s32 %s1275_s23, %s1343_s25  ;;  %p38_p0 = scmp.ne.s32.totalorder %s1271_s22, %s1267_s21 }
   0xc   : > { %p29_p1 = scmp.eq.s32.totalorder %s28_s27, 0  ;;  %p39_p2 = scmp.eq.s32.totalorder %s1275_s23, 0 }
   0xd   : > { %p44_p3 = scmp.ne.s32.totalorder %s1267_s21, %s1263_s20  ;;  %p1710_p4 = scmp.eq.s32.totalorder %s1339_s4, 0 }
   0xe   : > { %s1355_s28 = scalar_select %p29_p1, %s1271_s22, %s31_s26  }
   0xf   : > { %p1357_p5 = por %p39_p2, %p38_p0  ;;  %p1363_p6 = por %p1710_p4, %p44_p3 }
  0x10   : > { %p152_p7 = scmp.eq.s32.totalorder %s1339_s4, 1  ;;  %p158_p8 = scmp.eq.s32.totalorder %s883_s24, 1 }
  0x11   : > { %p884_p9 = scmp.ge.s32.totalorder %s1275_s23, 1  ;;  %p165_p10 = scmp.lt.s32.totalorder %s1275_s23, 3 }
  0x12   : > { %p1370_p11 = por %p152_p7, %p38_p0  ;;  %p1374_p12 = por %p158_p8, %p44_p3 }
  0x13   : > { %p1378_p13 = pnand %p884_p9, %p165_p10  ;;  %s176_s11 = sshll.u32 %s1703_s1, 4  ;;  %s177_s11 = int_to_ptr.hbm [resolvable:$true] %s176_s11 }
  0x14   : > { %s1714_s7 = scalar_select %p1374_p12, 1, 0 }
  0x15   : > { %p1010_p1 = pneg %p1378_p13  ;;  %s1277_s12 = smov [#allocation6]  }
  0x16   : > { %s178_s13 = sshll.u32 %s1277_s12, 4  ;;  %s1278_s14 = smov 64   ;;  %s179_s13 = int_to_ptr.vmem [resolvable:$true] %s178_s13 }
  0x17   : > { %p1011_p0 = pnand %p1010_p1, %p1710_p4  ;;  %s1279_s15 = smov 4  }
  0x18   : > { %p1709_p2 = scmp.ge.s32.totalorder %s1275_s23, 2 }
  0x19   : > { %1013 = dma.hbm_to_vmem [thread:$0]  (!%p1011_p0), %s177_s11, 2048, %s179_s13, [#allocation7], %s1278_s14, %s1278_s14, %s1279_s15  }
  0x1a   : > { %197 = sbr.rel (%p1709_p2) target bundleno = 68 (0x44), region = 32 }
  0x1f   : > { %200 = sbr.rel (!%p1357_p5) target bundleno = 68 (0x44), region = 36  ;;  %s201_s16 = sand.u32 (%p1357_p5), 1, %s1271_s22  }
  0x20   : > { %s888_s17 = sshll.u32 (%p1357_p5), %s1275_s23, 5  ;;  %s887_s18 = sshll.u32 (%p1357_p5), %s201_s16, 9 }
  0x21   : > { %s207_s19 = ssub.s32 (%p1357_p5), 38, %s888_s17  ;;  %s1399_s9 = scalar_lea.sflag (%p1357_p5), [#allocation4], %s201_s16 }
  0x22   : > { %p208_p3 = scmp.lt.s32.totalorder (%p1357_p5), %s207_s19, 32  ;;  %s205_s10 = scalar_lea.vmem (%p1357_p5), [#allocation3], %s887_s18 }
  0x24   : > { %s1727_s19 = smov (!%p208_p3, %s207_s19), 32 }
  0x25   : > { %s969_s24 = sshll.u32 %s1727_s19, 4 }
  0x26   : > { %s212_s26 = ssub.s32 512, %s969_s24 }
  0x27   : > { %s213_s27 = sshll.u32 %s212_s26, 4 }
  0x28   : > { %214 = vsyncadd %s1399_s9, %s213_s27  ;;  %p1402_p5 = scmp.ne.s32.totalorder %s969_s24, 0  ;;  %s971_s11 = sshll.u32 %s1275_s23, 9 }
  0x29   : > { %s218_s14 = scalar_lea.hbm %s1702_s0, %s971_s11  ;;  %s1410_s15 = sshll.u32 %s205_s10, 4  ;;  %s223_s15 = int_to_ptr.vmem [resolvable:$true] %s1410_s15 }
  0x2a   : > { %s220_s16 = sshll.u32 %s218_s14, 4  ;;  %s1708_s17 = sshll.u32 %s1727_s19, 8  ;;  %s1413_s16 = int_to_ptr.hbm [resolvable:$true] %s220_s16 }
  0x2b   : > { %s1155_s18 = sshra.s32 %s1413_s16, 4  ;;  %s1157_s24 = sshrl.u32 %s1708_s17, 4  ;;  %s1156_s18 = int_to_ptr.hbm [resolvable:$true] %s1155_s18 }
  0x2c   : > { %s1162_s26 = scalar_lea.hbm %s1156_s18, %s1157_s24  ;;  %s1166_s10 = scalar_lea.hbm %s1702_s0, 608 }
  0x2d   : > { %p1163_p7 = scmp.ne.s32.totalorder %s1156_s18, %s1162_s26  ;;  %p1167_p10 = scmp.lt.s32.totalorder %s1156_s18, %s1702_s0 }
  0x2e   : > { %p1168_p1 = scmp.lt.s32.totalorder %s1166_s10, %s1162_s26 }
  0x2f   : > { %p1164_p8 = pnand %p1163_p7, %p1402_p5 }
  0x30   : > { %p1169_p0 = por %p1168_p1, %p1167_p10 }
  0x31   : > { %p1165_p9 = pneg %p1164_p8 }
  0x33   : > { %p1170_p3 = pnand %p1169_p0, %p1165_p9 }
  0x35   : > { %1173 = shalt.err (!%p1170_p3)
}
  0x36   : > { %s1174_s14 = sshra.s32 %s223_s15, 4  ;;  %s1280_s27 = smov [#allocation3]   ;;  %s1175_s14 = int_to_ptr.vmem [resolvable:$true] %s1174_s14 }
  0x37   : > { %s1181_s17 = scalar_lea.vmem %s1175_s14, %s1157_s24  ;;  %s1185_s11 = scalar_lea.vmem %s1280_s27, 1024 }
  0x38   : > { %p1182_p7 = scmp.ne.s32.totalorder %s1175_s14, %s1181_s17  ;;  %p1187_p4 = scmp.lt.s32.totalorder %s1185_s11, %s1181_s17 }
  0x3a   : > { %p1183_p8 = pnand %p1182_p7, %p1402_p5 }
  0x3c   : > { %p1184_p2 = pneg %p1183_p8 }
  0x3e   : > { %p1189_p12 = pnand %p1187_p4, %p1184_p2 }
  0x40   : > { %1192 = shalt.err (!%p1189_p12)
}
  0x41   : > { %s1281_s18 = smov 256   ;;  %s1282_s26 = smov 16  }
  0x42   : > { %s1717_s10 = sshll.u32 %s1727_s19, 8 }
  0x43   : > { %228 = dma.hbm_to_vmem [thread:$0]  (%p1402_p5), %s1413_s16, %s1717_s10, %s223_s15, %s1399_s9, %s1281_s18, %s1281_s18, %s1282_s26  }
  0x44 PF: > { %234 = sbr.rel (%p1378_p13) target bundleno = 600 (0x258), region = 40  ;;  %s1442_s17 = sand.u32 (!%p1378_p13), 1, %s1267_s21  }
  0x45   : > { %s897_s24 = sshll.u32 (!%p1378_p13), %s1442_s17, 9  ;;  %s237_s12 = scalar_lea.sflag (!%p1378_p13), [#allocation4], %s1442_s17 }
  0x46   : > { %s1446_s13 = scalar_lea.vmem (!%p1378_p13), [#allocation3], %s897_s24 }
  0x49   : > { %1250 = dma.done.wait (%p1363_p6), %s237_s12, 8192  }
  0x4a   : > { %1252 = vsyncadd (%p1363_p6), %s237_s12, 4294959104  ;;  %p1718_p4 = scmp.eq.s32.totalorder %s1339_s4, 0 }
  0x4c   : > { %1254 = dma.done.wait (%p1718_p4), [#allocation7], 2048   ;;  %p1719_p12 = pmov %p1718_p4 }
  0x4d   : > { %v979_v1 = vld [vmem:[#allocation6 + $0x38] sm:$0xff]  ;;  %v978_v3 = vld [vmem:[#allocation6 + $0x30] sm:$0xff]  ;;  %v977_v5 = vld [vmem:[#allocation6 + $0x28] sm:$0xff]  ;;  %s899_s29 = sshll.u32 %s1442_s17, 1  ;;  %vm774_vm0 = vcmask 1040384   ;;  %s783_s16 = scalar_lea.sflag [#allocation5], %s1442_s17 }
  0x4e   : > { %1256 = vsyncadd (%p1719_p12), [#allocation7], 4294965248  ;;  %v987_v2 = vld [vmem:[#allocation6 + $0x78] sm:$0xff]  ;;  %511 = vmatpush.bf16.msra.mxu0 %v979_v1  ;;  %988 = vmatpush.bf16.msra.mxu2 %v979_v1  ;;  %v986_v4 = vld [vmem:[#allocation6 + $0x70] sm:$0xff]  ;;  %s272_s15 = scalar_lea.vmem [#allocation8], %s899_s29  ;;  %s965_s14 = sshll.u32 (%p1370_p11), %s1339_s4, 1 }
  0x4f   : > { %600 = vmatpush.bf16.msra.mxu1 %v987_v2  ;;  %996 = vmatpush.bf16.msra.mxu3 %v987_v2  ;;  %v985_v6 = vld [vmem:[#allocation6 + $0x68] sm:$0xff]  ;;  %v976_v7 = vld [vmem:[#allocation6 + $0x20] sm:$0xff]  ;;  %v975_v9 = vld [vmem:[#allocation6 + $0x18] sm:$0xff]  ;;  %s791_s27 = ssub.s32 (%p1370_p11), 3, %s965_s14 }
  0x50   : > { %v984_v8 = vld [vmem:[#allocation6 + $0x60] sm:$0xff]  ;;  %v983_v10 = vld [vmem:[#allocation6 + $0x58] sm:$0xff]  ;;  %v974_v11 = vld [vmem:[#allocation6 + $0x10] sm:$0xff]  ;;  %p792_p6 = scmp.lt.s32.totalorder (%p1370_p11), %s791_s27, 2 }
  0x51   : > { %v982_v12 = vld [vmem:[#allocation6 + $0x50] sm:$0xff]  ;;  %v973_v13 = vld [vmem:[#allocation6 + $0x8] sm:$0xff]  ;;  %v972_v15 = vld [vmem:[#allocation6] sm:$0xff] }
  0x52   : > { %512 = vmatpush.bf16.msra.mxu0 %v978_v3  ;;  %989 = vmatpush.bf16.msra.mxu2 %v978_v3  ;;  %v981_v14 = vld [vmem:[#allocation6 + $0x48] sm:$0xff]  ;;  %v980_v16 = vld [vmem:[#allocation6 + $0x40] sm:$0xff]  ;;  %v285_v18 = vld [vmem:[%s1446_s13 + $0x10] sm:$0xff] }
  0x53   : > { %601 = vmatpush.bf16.msra.mxu1 %v986_v4  ;;  %997 = vmatpush.bf16.msra.mxu3 %v986_v4  ;;  %v283_v17 = vld [vmem:[%s1446_s13] sm:$0xff]  ;;  %v321_v20 = vld [vmem:[%s1446_s13 + $0x130] sm:$0xff]  ;;  %v284_v21 = vld [vmem:[%s1446_s13 + $0x8] sm:$0xff] }
  0x54   : > { %v319_v19 = vld [vmem:[%s1446_s13 + $0x120] sm:$0xff]  ;;  %v286_v22 = vld [vmem:[%s1446_s13 + $0x18] sm:$0xff]  ;;  %v320_v23 = vld [vmem:[%s1446_s13 + $0x128] sm:$0xff]  ;;  %v347_v25 = vpack.c.bf16 %v285_v18, %v283_v17 }
  0x55   : > { %v322_v24 = vld [vmem:[%s1446_s13 + $0x138] sm:$0xff]  ;;  %v365_v26 = vpack.c.bf16 %v321_v20, %v319_v19  ;;  %v348_v27 = vpack.c.bf16 %v286_v22, %v284_v21  ;;  %v287_v29 = vld [vmem:[%s1446_s13 + $0x20] sm:$0xff]  ;;  %v289_v30 = vld [vmem:[%s1446_s13 + $0x30] sm:$0xff] }
  0x56   : > { %513 = vmatpush.bf16.msra.mxu0 %v977_v5  ;;  %990 = vmatpush.bf16.msra.mxu2 %v977_v5  ;;  %v366_v28 = vpack.c.bf16 %v322_v24, %v320_v23  ;;  %v323_v31 = vld [vmem:[%s1446_s13 + $0x140] sm:$0xff]  ;;  %v325_v32 = vld [vmem:[%s1446_s13 + $0x150] sm:$0xff]  ;;  %v288_v33 = vld [vmem:[%s1446_s13 + $0x28] sm:$0xff]  ;;  %v349_v37 = vpack.c.bf16 %v289_v30, %v287_v29 }
  0x57   : > { %602 = vmatpush.bf16.msra.mxu1 %v985_v6  ;;  %998 = vmatpush.bf16.msra.mxu3 %v985_v6  ;;  %v290_v34 = vld [vmem:[%s1446_s13 + $0x38] sm:$0xff]  ;;  %v324_v35 = vld [vmem:[%s1446_s13 + $0x148] sm:$0xff]  ;;  %v367_v38 = vpack.c.bf16 %v325_v32, %v323_v31  ;;  %v291_v41 = vld [vmem:[%s1446_s13 + $0x40] sm:$0xff] }
  0x58   : > { %v326_v36 = vld [vmem:[%s1446_s13 + $0x158] sm:$0xff]  ;;  %v350_v39 = vpack.c.bf16 %v290_v34, %v288_v33  ;;  %v293_v42 = vld [vmem:[%s1446_s13 + $0x50] sm:$0xff]  ;;  %v327_v43 = vld [vmem:[%s1446_s13 + $0x160] sm:$0xff] }
  0x59   : > { %v368_v40 = vpack.c.bf16 %v326_v36, %v324_v35  ;;  %v329_v44 = vld [vmem:[%s1446_s13 + $0x170] sm:$0xff]  ;;  %v292_v45 = vld [vmem:[%s1446_s13 + $0x48] sm:$0xff]  ;;  %v294_v46 = vld [vmem:[%s1446_s13 + $0x58] sm:$0xff]  ;;  %v351_v49 = vpack.c.bf16 %v293_v42, %v291_v41 }
  0x5a   : > { %514 = vmatpush.bf16.msra.mxu0 %v976_v7  ;;  %991 = vmatpush.bf16.msra.mxu2 %v976_v7  ;;  %v328_v47 = vld [vmem:[%s1446_s13 + $0x168] sm:$0xff]  ;;  %v330_v48 = vld [vmem:[%s1446_s13 + $0x178] sm:$0xff]  ;;  %v369_v50 = vpack.c.bf16 %v329_v44, %v327_v43  ;;  %v352_v51 = vpack.c.bf16 %v294_v46, %v292_v45  ;;  %v295_v53 = vld [vmem:[%s1446_s13 + $0x60] sm:$0xff] }
  0x5b   : > { %603 = vmatpush.bf16.msra.mxu1 %v984_v8  ;;  %999 = vmatpush.bf16.msra.mxu3 %v984_v8  ;;  %v370_v52 = vpack.c.bf16 %v330_v48, %v328_v47  ;;  %v297_v54 = vld [vmem:[%s1446_s13 + $0x70] sm:$0xff]  ;;  %v331_v55 = vld [vmem:[%s1446_s13 + $0x180] sm:$0xff]  ;;  %v296_v57 = vld [vmem:[%s1446_s13 + $0x68] sm:$0xff] }
  0x5c   : > { %v333_v56 = vld [vmem:[%s1446_s13 + $0x190] sm:$0xff]  ;;  %v298_v58 = vld [vmem:[%s1446_s13 + $0x78] sm:$0xff]  ;;  %v332_v59 = vld [vmem:[%s1446_s13 + $0x188] sm:$0xff]  ;;  %v353_v61 = vpack.c.bf16 %v297_v54, %v295_v53 }
  0x5d   : > { %v334_v60 = vld [vmem:[%s1446_s13 + $0x198] sm:$0xff]  ;;  %v371_v62 = vpack.c.bf16 %v333_v56, %v331_v55  ;;  %v354_v63 = vpack.c.bf16 %v298_v58, %v296_v57  ;;  %v299_v1 = vld [vmem:[%s1446_s13 + $0x80] sm:$0xff]  ;;  %v301_v2 = vld [vmem:[%s1446_s13 + $0x90] sm:$0xff] }
  0x5e   : > { %515 = vmatpush.bf16.msra.mxu0 %v975_v9  ;;  %992 = vmatpush.bf16.msra.mxu2 %v975_v9  ;;  %v372_v0 = vpack.c.bf16 %v334_v60, %v332_v59  ;;  %v335_v3 = vld [vmem:[%s1446_s13 + $0x1a0] sm:$0xff]  ;;  %v337_v4 = vld [vmem:[%s1446_s13 + $0x1b0] sm:$0xff]  ;;  %v300_v5 = vld [vmem:[%s1446_s13 + $0x88] sm:$0xff]  ;;  %v355_v9 = vpack.c.bf16 %v301_v2, %v299_v1 }
  0x5f   : > { %604 = vmatpush.bf16.msra.mxu1 %v983_v10  ;;  %1000 = vmatpush.bf16.msra.mxu3 %v983_v10  ;;  %v302_v6 = vld [vmem:[%s1446_s13 + $0x98] sm:$0xff]  ;;  %v336_v7 = vld [vmem:[%s1446_s13 + $0x1a8] sm:$0xff]  ;;  %v373_v10 = vpack.c.bf16 %v337_v4, %v335_v3  ;;  %v315_v47 = vld [vmem:[%s1446_s13 + $0x100] sm:$0xff] }
  0x60   : > { %v338_v8 = vld [vmem:[%s1446_s13 + $0x1b8] sm:$0xff]  ;;  %v304_v17 = vld [vmem:[%s1446_s13 + $0xa8] sm:$0xff]  ;;  %v317_v48 = vld [vmem:[%s1446_s13 + $0x110] sm:$0xff] }
  0x61   : > { %v306_v18 = vld [vmem:[%s1446_s13 + $0xb8] sm:$0xff]  ;;  %v340_v19 = vld [vmem:[%s1446_s13 + $0x1c8] sm:$0xff] }
  0x62   : > { %516 = vmatpush.bf16.msra.mxu0 %v974_v11  ;;  %993 = vmatpush.bf16.msra.mxu2 %v974_v11  ;;  %v356_v11 = vpack.c.bf16 %v302_v6, %v300_v5  ;;  %v342_v20 = vld [vmem:[%s1446_s13 + $0x1d8] sm:$0xff]  ;;  %v358_v23 = vpack.c.bf16 %v306_v18, %v304_v17  ;;  %v308_v29 = vld [vmem:[%s1446_s13 + $0xc8] sm:$0xff] }
  0x63   : > { %605 = vmatpush.bf16.msra.mxu1 %v982_v12  ;;  %1001 = vmatpush.bf16.msra.mxu3 %v982_v12  ;;  %v374_v12 = vpack.c.bf16 %v338_v8, %v336_v7  ;;  %v376_v24 = vpack.c.bf16 %v342_v20, %v340_v19  ;;  %v310_v30 = vld [vmem:[%s1446_s13 + $0xd8] sm:$0xff]  ;;  %v344_v31 = vld [vmem:[%s1446_s13 + $0x1e8] sm:$0xff] }
  0x64   : > { %v346_v32 = vld [vmem:[%s1446_s13 + $0x1f8] sm:$0xff]  ;;  %v360_v35 = vpack.c.bf16 %v310_v30, %v308_v29 }
  0x65   : > { %v378_v36 = vpack.c.bf16 %v346_v32, %v344_v31  ;;  %v1519_v43 = vld [vmem:[%s1704_s2] ss:$0 sm:$0xff] }
  0x66   : > { %517 = vmatpush.bf16.msra.mxu0 %v973_v13  ;;  %994 = vmatpush.bf16.msra.mxu2 %v973_v13  ;;  %v303_v13 = vld [vmem:[%s1446_s13 + $0xa0] sm:$0xff] }
  0x67   : > { %606 = vmatpush.bf16.msra.mxu1 %v981_v14  ;;  %1002 = vmatpush.bf16.msra.mxu3 %v981_v14  ;;  %v305_v14 = vld [vmem:[%s1446_s13 + $0xb0] sm:$0xff] }
  0x68   : > { %v357_v21 = vpack.c.bf16 %v305_v14, %v303_v13 }
  0x6a   : > { %518 = vmatpush.bf16.msra.mxu0 %v972_v15  ;;  %995 = vmatpush.bf16.msra.mxu2 %v972_v15  ;;  %v339_v15 = vld [vmem:[%s1446_s13 + $0x1c0] sm:$0xff] }
  0x6b   : > { %607 = vmatpush.bf16.msra.mxu1 %v980_v16  ;;  %1003 = vmatpush.bf16.msra.mxu3 %v980_v16  ;;  %v341_v16 = vld [vmem:[%s1446_s13 + $0x1d0] sm:$0xff] }
  0x6c   : > { %v375_v22 = vpack.c.bf16 %v341_v16, %v339_v15 }
  0x6d   : > { %519 = vmatmul.bf16.vlgmr.msra.gmra.mxu0 %v347_v25  ;;  %564 = vmatmul.bf16.vlgmr.msra.gmra.mxu2 %v365_v26  ;;  %v307_v25 = vld [vmem:[%s1446_s13 + $0xc0] sm:$0xff]  ;;  %v309_v26 = vld [vmem:[%s1446_s13 + $0xd0] sm:$0xff] }
  0x6e   : > { %608 = vmatmul.bf16.vlgmr.msra.gmra.mxu1 %v348_v27  ;;  %653 = vmatmul.bf16.vlgmr.msra.gmra.mxu3 %v366_v28  ;;  %v343_v27 = vld [vmem:[%s1446_s13 + $0x1e0] sm:$0xff]  ;;  %v345_v28 = vld [vmem:[%s1446_s13 + $0x1f0] sm:$0xff]  ;;  %v359_v33 = vpack.c.bf16 %v309_v26, %v307_v25 }
  0x6f   : > { %v377_v34 = vpack.c.bf16 %v345_v28, %v343_v27 }
  0x7d   : > { %524 = vmatmul.bf16.gmra.mxu0 %v349_v37  ;;  %569 = vmatmul.bf16.gmra.mxu2 %v367_v38  ;;  %v311_v37 = vld [vmem:[%s1446_s13 + $0xe0] sm:$0xff]  ;;  %v313_v38 = vld [vmem:[%s1446_s13 + $0xf0] sm:$0xff] }
  0x7e   : > { %613 = vmatmul.bf16.gmra.mxu1 %v350_v39  ;;  %658 = vmatmul.bf16.gmra.mxu3 %v368_v40  ;;  %v312_v39 = vld [vmem:[%s1446_s13 + $0xe8] sm:$0xff]  ;;  %v314_v40 = vld [vmem:[%s1446_s13 + $0xf8] sm:$0xff]  ;;  %v361_v41 = vpack.c.bf16 %v313_v38, %v311_v37 }
  0x7f   : > { %v362_v42 = vpack.c.bf16 %v314_v40, %v312_v39 }
  0x8d   : > { %529 = vmatmul.bf16.gmra.mxu0 %v351_v49  ;;  %574 = vmatmul.bf16.gmra.mxu2 %v369_v50  ;;  %v363_v49 = vpack.c.bf16 %v317_v48, %v315_v47 }
  0x8e   : > { %618 = vmatmul.bf16.gmra.mxu1 %v352_v51  ;;  %663 = vmatmul.bf16.gmra.mxu3 %v370_v52  ;;  %v316_v51 = vld [vmem:[%s1446_s13 + $0x108] sm:$0xff]  ;;  %v318_v52 = vld [vmem:[%s1446_s13 + $0x118] sm:$0xff] }
  0x8f   : > { %v364_v53 = vpack.c.bf16 %v318_v52, %v316_v51 }
  0x9d   : > { %534 = vmatmul.bf16.gmra.mxu0 %v353_v61  ;;  %579 = vmatmul.bf16.gmra.mxu2 %v371_v62 }
  0x9e   : > { %623 = vmatmul.bf16.gmra.mxu1 %v354_v63  ;;  %668 = vmatmul.bf16.gmra.mxu3 %v372_v0 }
  0xad   : > { %539 = vmatmul.bf16.gmra.mxu0 %v355_v9  ;;  %584 = vmatmul.bf16.gmra.mxu2 %v373_v10 }
  0xae   : > { %628 = vmatmul.bf16.gmra.mxu1 %v356_v11  ;;  %673 = vmatmul.bf16.gmra.mxu3 %v374_v12 }
  0xbd   : > { %544 = vmatmul.bf16.gmra.mxu0 %v357_v21  ;;  %589 = vmatmul.bf16.gmra.mxu2 %v375_v22 }
  0xbe   : > { %633 = vmatmul.bf16.gmra.mxu1 %v358_v23  ;;  %678 = vmatmul.bf16.gmra.mxu3 %v376_v24 }
  0xcd   : > { %549 = vmatmul.bf16.gmra.mxu0 %v359_v33  ;;  %594 = vmatmul.bf16.gmra.mxu2 %v377_v34 }
  0xce   : > { %638 = vmatmul.bf16.gmra.mxu1 %v360_v35  ;;  %683 = vmatmul.bf16.gmra.mxu3 %v378_v36 }
  0xdd   : > { %554 = vmatmul.bf16.gmra.mxu0 %v361_v41 }
  0xde   : > { %643 = vmatmul.bf16.gmra.mxu1 %v362_v42 }
  0xea   : > { %v520_v44 = vpop.f32.mrf.mxu0 }
  0xeb   : > { %v521_v45 = vadd.f32 %v1519_v43, %v520_v44  ;;  %v609_v46 = vpop.f32.mrf.mxu1 }
  0xed   : > { %v610_v50 = vadd.f32 %v609_v46, %v521_v45  ;;  %559 = vmatmul.bf16.gmra.mxu0 %v363_v49 }
  0xee   : > { %648 = vmatmul.bf16.gmra.mxu1 %v364_v53 }
  0xef   : > { %1061 = vtanh.f32 %v610_v50 }
  0xf0   : > { %v565_v54 = vpop.f32.mrf.mxu2 }
  0xf1   : > { %v566_v55 = vadd.f32 %v1519_v43, %v565_v54  ;;  %v654_v56 = vpop.f32.mrf.mxu3 }
  0xf2   : > { %v522_v57 = vpop.f32.mrf.mxu0 }
  0xf3   : > { %v523_v58 = vadd.f32 %v1519_v43, %v522_v57  ;;  %v611_v59 = vpop.f32.mrf.mxu1  ;;  %v655_v60 = vadd.f32 %v654_v56, %v566_v55 }
  0xf5   : > { %v612_v61 = vadd.f32 %v611_v59, %v523_v58  ;;  %v1530_v5 = vpop.eup %1061 }
  0xf7   : > { %1063 = vtanh.f32 %v612_v61 }
  0xf8   : > { %v567_v62 = vpop.f32.mrf.mxu2  ;;  %1065 = vtanh.f32 %v655_v60 }
  0xf9   : > { %v568_v63 = vadd.f32 %v1519_v43, %v567_v62  ;;  %v656_v0 = vpop.f32.mrf.mxu3 }
  0xfa   : > { %v525_v1 = vpop.f32.mrf.mxu0 }
  0xfb   : > { %v526_v2 = vadd.f32 %v1519_v43, %v525_v1  ;;  %v614_v3 = vpop.f32.mrf.mxu1  ;;  %v657_v4 = vadd.f32 %v656_v0, %v568_v63 }
  0xfd   : > { %v1532_v6 = vpop.eup %1063  ;;  %v615_v7 = vadd.f32 %v614_v3, %v526_v2  ;;  %1067 = vtanh.f32 %v657_v4 }
  0xfe   : > { %v722_v8 = vpack.c.bf16 %v1532_v6, %v1530_v5  ;;  %v1536_v10 = vpop.eup %1065 }
  0xff   : > { %1069 = vtanh.f32 %v615_v7 }
 0x100   : > { %v570_v9 = vpop.f32.mrf.mxu2 }
 0x101   : > { %v571_v11 = vadd.f32 %v1519_v43, %v570_v9  ;;  %v659_v12 = vpop.f32.mrf.mxu3 }
 0x102   : > { %v527_v13 = vpop.f32.mrf.mxu0 }
 0x103   : > { %v1539_v14 = vpop.eup %1067  ;;  %v528_v15 = vadd.f32 %v1519_v43, %v527_v13  ;;  %v616_v16 = vpop.f32.mrf.mxu1  ;;  %v660_v17 = vadd.f32 %v659_v12, %v571_v11 }
 0x104   : > { %v731_v18 = vpack.c.bf16 %v1539_v14, %v1536_v10 }
 0x105   : > { %v617_v19 = vadd.f32 %v616_v16, %v528_v15  ;;  %v1546_v27 = vpop.eup %1069 }
 0x107   : > { %1071 = vtanh.f32 %v617_v19 }
 0x108   : > { %v572_v20 = vpop.f32.mrf.mxu2  ;;  %1073 = vtanh.f32 %v660_v17 }
 0x109   : > { %v573_v21 = vadd.f32 %v1519_v43, %v572_v20  ;;  %v661_v22 = vpop.f32.mrf.mxu3 }
 0x10a   : > { %v530_v23 = vpop.f32.mrf.mxu0 }
 0x10b   : > { %v531_v24 = vadd.f32 %v1519_v43, %v530_v23  ;;  %v619_v25 = vpop.f32.mrf.mxu1  ;;  %v662_v26 = vadd.f32 %v661_v22, %v573_v21 }
 0x10d   : > { %v1548_v28 = vpop.eup %1071  ;;  %v620_v29 = vadd.f32 %v619_v25, %v531_v24  ;;  %1075 = vtanh.f32 %v662_v26 }
 0x10e   : > { %v723_v30 = vpack.c.bf16 %v1548_v28, %v1546_v27  ;;  %v1552_v32 = vpop.eup %1073 }
 0x10f   : > { %1077 = vtanh.f32 %v620_v29 }
 0x110   : > { %v575_v31 = vpop.f32.mrf.mxu2 }
 0x111   : > { %v576_v33 = vadd.f32 %v1519_v43, %v575_v31  ;;  %v664_v34 = vpop.f32.mrf.mxu3 }
 0x112   : > { %v532_v35 = vpop.f32.mrf.mxu0 }
 0x113   : > { %v1555_v36 = vpop.eup %1075  ;;  %v533_v37 = vadd.f32 %v1519_v43, %v532_v35  ;;  %v621_v38 = vpop.f32.mrf.mxu1  ;;  %v665_v39 = vadd.f32 %v664_v34, %v576_v33 }
 0x114   : > { %v732_v40 = vpack.c.bf16 %v1555_v36, %v1552_v32  ;;  %v721_v36 = vld [vmem:[%s1705_s3] sm:$0x1] }
 0x115   : > { %v622_v41 = vadd.f32 %v621_v38, %v533_v37  ;;  %v1562_v50 = vpop.eup %1077 }
 0x117   : > { %1079 = vtanh.f32 %v622_v41 }
 0x118   : > { %v577_v42 = vpop.f32.mrf.mxu2  ;;  %1081 = vtanh.f32 %v665_v39 }
 0x119   : > { %v578_v44 = vadd.f32 %v1519_v43, %v577_v42  ;;  %v666_v45 = vpop.f32.mrf.mxu3 }
 0x11a   : > { %v535_v46 = vpop.f32.mrf.mxu0 }
 0x11b   : > { %v536_v47 = vadd.f32 %v1519_v43, %v535_v46  ;;  %v624_v48 = vpop.f32.mrf.mxu1  ;;  %v667_v49 = vadd.f32 %v666_v45, %v578_v44 }
 0x11d   : > { %v1564_v51 = vpop.eup %1079  ;;  %v625_v52 = vadd.f32 %v624_v48, %v536_v47  ;;  %1083 = vtanh.f32 %v667_v49 }
 0x11e   : > { %v724_v53 = vpack.c.bf16 %v1564_v51, %v1562_v50  ;;  %v1568_v55 = vpop.eup %1081  ;;  %v777_v50 = vlaneseq }
 0x11f   : > { %1085 = vtanh.f32 %v625_v52 }
 0x120   : > { %v580_v54 = vpop.f32.mrf.mxu2  ;;  %vm779_vm1 = vcmp.lt.s32.totalorder %v777_v50, 256 }
 0x121   : > { %v581_v56 = vadd.f32 %v1519_v43, %v580_v54  ;;  %v669_v57 = vpop.f32.mrf.mxu3 }
 0x122   : > { %v537_v58 = vpop.f32.mrf.mxu0 }
 0x123   : > { %v1571_v59 = vpop.eup %1083  ;;  %v538_v60 = vadd.f32 %v1519_v43, %v537_v58  ;;  %v626_v61 = vpop.f32.mrf.mxu1  ;;  %v670_v62 = vadd.f32 %v669_v57, %v581_v56 }
 0x124   : > { %v733_v63 = vpack.c.bf16 %v1571_v59, %v1568_v55  ;;  %v1283_v55 = vmov 0  }
 0x125   : > { %v627_v0 = vadd.f32 %v626_v61, %v538_v60  ;;  %v1578_v12 = vpop.eup %1085  ;;  %1059 = vset.pattern.permute.xlu0 %v1283_v55 }
 0x127   : > { %1087 = vtanh.f32 %v627_v0 }
 0x128   : > { %v582_v1 = vpop.f32.mrf.mxu2  ;;  %1089 = vtanh.f32 %v670_v62 }
 0x129   : > { %v583_v2 = vadd.f32 %v1519_v43, %v582_v1  ;;  %v671_v3 = vpop.f32.mrf.mxu3 }
 0x12a   : > { %v540_v4 = vpop.f32.mrf.mxu0 }
 0x12b   : > { %v541_v7 = vadd.f32 %v1519_v43, %v540_v4  ;;  %v629_v9 = vpop.f32.mrf.mxu1  ;;  %v672_v11 = vadd.f32 %v671_v3, %v583_v2 }
 0x12d   : > { %v1580_v13 = vpop.eup %1087  ;;  %v630_v15 = vadd.f32 %v629_v9, %v541_v7  ;;  %1091 = vtanh.f32 %v672_v11 }
 0x12e   : > { %v725_v16 = vpack.c.bf16 %v1580_v13, %v1578_v12  ;;  %v1584_v19 = vpop.eup %1089 }
 0x12f   : > { %1093 = vtanh.f32 %v630_v15 }
 0x130   : > { %v585_v17 = vpop.f32.mrf.mxu2 }
 0x131   : > { %v674_v20 = vpop.f32.mrf.mxu3 }
 0x132   : > { %v542_v21 = vpop.f32.mrf.mxu0 }
 0x133   : > { %v1586_v22 = vpop.eup %1091  ;;  %v543_v23 = vadd.f32 %v1519_v43, %v542_v21  ;;  %v631_v24 = vpop.f32.mrf.mxu1  ;;  %v586_v21 = vadd.f32 %v1519_v43, %v585_v17 }
 0x134   : > { %v734_v25 = vpack.c.bf16 %v1586_v22, %v1584_v19  ;;  %v738_v22 = vld [vmem:[#allocation2] sm:$0x1] }
 0x135   : > { %v632_v26 = vadd.f32 %v631_v24, %v543_v23  ;;  %v1595_v35 = vpop.eup %1093  ;;  %741 = vperm.xlu0 %1059, %v738_v22  }
 0x137   : > { %1095 = vtanh.f32 %v632_v26 }
 0x138   : > { %v587_v29 = vpop.f32.mrf.mxu2 }
 0x139   : > { %v676_v31 = vpop.f32.mrf.mxu3 }
 0x13a   : > { %v1591_v33 = vpop.f32.mrf.mxu0 }
 0x13b   : > { %v1593_v34 = vpop.f32.mrf.mxu1 }
 0x13d   : > { %v1597_v37 = vpop.eup %1095 }
 0x13e   : > { %v726_v38 = vpack.c.bf16 %v1597_v37, %v1595_v35 }
 0x140   : > { %v590_v39 = vpop.f32.mrf.mxu2 }
 0x141   : > { %v679_v41 = vpop.f32.mrf.mxu3  ;;  %v591_v0 = vadd.f32 %v1519_v43, %v590_v39  ;;  %v588_v39 = vadd.f32 %v1519_v43, %v587_v29 }
 0x142   : > { %v547_v42 = vpop.f32.mrf.mxu0 }
 0x143   : > { %v636_v44 = vpop.f32.mrf.mxu1  ;;  %v680_v7 = vadd.f32 %v679_v41, %v591_v0 }
 0x148   : > { %v592_v45 = vpop.f32.mrf.mxu2 }
 0x149   : > { %v681_v46 = vpop.f32.mrf.mxu3  ;;  %v593_v2 = vadd.f32 %v1519_v43, %v592_v45 }
 0x14a   : > { %v550_v47 = vpop.f32.mrf.mxu0 }
 0x14b   : > { %v639_v48 = vpop.f32.mrf.mxu1  ;;  %v682_v11 = vadd.f32 %v681_v46, %v593_v2  ;;  %v677_v46 = vadd.f32 %v676_v31, %v588_v39  ;;  %v551_v17 = vadd.f32 %v1519_v43, %v550_v47  ;;  %v546_v31 = vadd.f32 %v1519_v43, %v1591_v33 }
 0x14d   : > { %v640_v29 = vadd.f32 %v639_v48, %v551_v17 }
 0x150   : > { %v595_v49 = vpop.f32.mrf.mxu2 }
 0x151   : > { %v684_v52 = vpop.f32.mrf.mxu3  ;;  %v596_v56 = vadd.f32 %v1519_v43, %v595_v49 }
 0x152   : > { %v552_v54 = vpop.f32.mrf.mxu0 }
 0x153   : > { %v641_v57 = vpop.f32.mrf.mxu1  ;;  %v685_v58 = vadd.f32 %v684_v52, %v596_v56  ;;  %v553_v56 = vadd.f32 %v1519_v43, %v552_v54 }
 0x155   : > { %1097 = vtanh.f32 %v685_v58  ;;  %v675_v58 = vadd.f32 %v674_v20, %v586_v21 }
 0x158   : > { %v597_v60 = vpop.f32.mrf.mxu2 }
 0x159   : > { %v598_v61 = vadd.f32 %v1519_v43, %v597_v60  ;;  %v686_v62 = vpop.f32.mrf.mxu3 }
 0x15a   : > { %v555_v1 = vpop.f32.mrf.mxu0 }
 0x15b   : > { %v644_v3 = vpop.f32.mrf.mxu1  ;;  %v687_v4 = vadd.f32 %v686_v62, %v598_v61  ;;  %v556_v9 = vadd.f32 %v1519_v43, %v555_v1  ;;  %v1098_v15 = vpop.eup %1097  ;;  %v642_v62 = vadd.f32 %v641_v57, %v553_v56 }
 0x15d   : > { %1099 = vtanh.f32 %v687_v4  ;;  %v645_v23 = vadd.f32 %v644_v3, %v556_v9  ;;  %v548_v3 = vadd.f32 %v1519_v43, %v547_v42 }
 0x15e   : > { %1101 = vtanh.f32 %v680_v7  ;;  %v635_v7 = vadd.f32 %v1593_v34, %v546_v31 }
 0x15f   : > { %1103 = vtanh.f32 %v682_v11  ;;  %v637_v4 = vadd.f32 %v636_v44, %v548_v3 }
 0x160   : > { %1105 = vtanh.f32 %v645_v23 }
 0x162   : > { %v557_v24 = vpop.f32.mrf.mxu0 }
 0x163   : > { %v1100_v26 = vpop.eup %1099  ;;  %v558_v45 = vadd.f32 %v1519_v43, %v557_v24  ;;  %v646_v49 = vpop.f32.mrf.mxu1 }
 0x164   : > { %v737_v52 = vpack.c.bf16 %v1100_v26, %v1098_v15  ;;  %v1102_v60 = vpop.eup %1101 }
 0x165   : > { %v647_v41 = vadd.f32 %v646_v49, %v558_v45  ;;  %v1104_v61 = vpop.eup %1103 }
 0x166   : > { %758 = vmatpush.bf16.xpose.msrb.mxu3 %v737_v52  ;;  %v1106_v0 = vpop.eup %1105  ;;  %v736_v1 = vpack.c.bf16 %v1104_v61, %v1102_v60 }
 0x167   : > { %1107 = vtanh.f32 %v647_v41 }
 0x168   : > { %1109 = vtanh.f32 %v675_v58 }
 0x169   : > { %1111 = vtanh.f32 %v677_v46 }
 0x16a   : > { %1113 = vtanh.f32 %v642_v62  ;;  %v560_v15 = vpop.f32.mrf.mxu0 }
 0x16b   : > { %1115 = vtanh.f32 %v640_v29  ;;  %v649_v44 = vpop.f32.mrf.mxu1  ;;  %v561_v23 = vadd.f32 %v1519_v43, %v560_v15 }
 0x16c   : > { %1117 = vtanh.f32 %v637_v4 }
 0x16d   : > { %v1108_v2 = vpop.eup %1107  ;;  %1119 = vtanh.f32 %v635_v7  ;;  %v650_v39 = vadd.f32 %v649_v44, %v561_v23 }
 0x16e   : > { %759 = vmatpush.bf16.xpose.msrb.mxu3 %v736_v1  ;;  %v729_v20 = vpack.c.bf16 %v1108_v2, %v1106_v0  ;;  %v1110_v47 = vpop.eup %1109 }
 0x16f   : > { %v1112_v54 = vpop.eup %1111  ;;  %1121 = vtanh.f32 %v650_v39 }
 0x170   : > { %745 = vmatpush.bf16.xpose.msrb.mxu2 %v729_v20  ;;  %v1114_v57 = vpop.eup %1113  ;;  %v735_v48 = vpack.c.bf16 %v1112_v54, %v1110_v47 }
 0x171   : > { %v1116_v9 = vpop.eup %1115 }
 0x172   : > { %v728_v11 = vpack.c.bf16 %v1114_v57, %v1116_v9  ;;  %v1118_v42 = vpop.eup %1117  ;;  %v562_v34 = vpop.f32.mrf.mxu0 }
 0x173   : > { %v1120_v21 = vpop.eup %1119  ;;  %v563_v24 = vadd.f32 %v1519_v43, %v562_v34  ;;  %v651_v26 = vpop.f32.mrf.mxu1 }
 0x174   : > { %v727_v33 = vpack.c.bf16 %v1118_v42, %v1120_v21 }
 0x175   : > { %v652_v19 = vadd.f32 %v651_v26, %v563_v24  ;;  %v1122_v59 = vpop.eup %1121 }
 0x176   : > { %760 = vmatpush.bf16.xpose.msrb.mxu3 %v735_v48 }
 0x177   : > { %1123 = vtanh.f32 %v652_v19 }
 0x178   : > { %746 = vmatpush.bf16.xpose.msrb.mxu2 %v728_v11 }
 0x17d   : > { %v1124_v43 = vpop.eup %1123 }
 0x17e   : > { %761 = vmatpush.bf16.xpose.msrb.mxu3 %v734_v25  ;;  %v730_v32 = vpack.c.bf16 %v1124_v43, %v1122_v59 }
 0x180   : > { %747 = vmatpush.bf16.xpose.msrb.mxu2 %v727_v33 }
 0x186   : > { %762 = vmatpush.bf16.xpose.msrb.mxu3 %v733_v63 }
 0x188   : > { %748 = vmatpush.bf16.xpose.msrb.mxu2 %v726_v38 }
 0x18e   : > { %763 = vmatpush.bf16.xpose.msrb.mxu3 %v732_v40 }
 0x190   : > { %749 = vmatpush.bf16.xpose.msrb.mxu2 %v725_v16 }
 0x196   : > { %764 = vmatpush.bf16.xpose.msrb.mxu3 %v731_v18 }
 0x198   : > { %750 = vmatpush.bf16.xpose.msrb.mxu2 %v724_v53 }
 0x19e   : > { %765 = vmatpush.bf16.xpose.msrb.mxu3 %v730_v32 }
 0x1a0   : > { %751 = vmatpush.bf16.xpose.msrb.mxu2 %v723_v30 }
 0x1a5   : > { %766 = vmatmul.bf16.vlgmr.msrb.gmra.mxu3 %v721_v36 }
 0x1a7   : > { %v742_v10 = vpop.permute.xlu0 %741 }
 0x1a8   : > { %752 = vmatpush.bf16.xpose.msrb.mxu2 %v722_v8  ;;  %v744_v18 = vperm.slane %v742_v10, 0 }
 0x1af   : > { %753 = vmatmul.bf16.vlgmr.msrb.gmra.mxu2 %v721_v36 }
 0x228   : > { %v767_v14 = vpop.f32.mrf.mxu3 }
 0x229   : > { %v768_v40 = vadd.f32 %v767_v14, %v744_v18 }
 0x22b   : > { %v773_v27 = vrot.slane %v768_v40, 7 }
 0x230   : > { %v769_v51 = vpop.f32.mrf.mxu3 }
 0x232   : > { %v754_v28 = vpop.f32.mrf.mxu2 }
 0x233   : > { %v755_v30 = vadd.f32 %v754_v28, %v744_v18 }
 0x235   : > { %v775_v53 = vsel %vm774_vm0, %v755_v30, %v773_v27 }
 0x236   : > { %781 = vst.msk [vmem:[%s272_s15] sm:$0x3] %vm779_vm1, %v775_v53  ;;  %789 = sbr.rel (!%p1370_p11) target bundleno = 600 (0x258), region = 52 }
 0x23a   : > { %v756_v63 = vpop.f32.mrf.mxu2 }
 0x23b   : > { %s1729_s27 = smov (!%p792_p6, %s791_s27), 2 }
 0x23c   : > { %s794_s11 = ssub.s32 2, %s1729_s27 }
 0x23d   : > { %s795_s18 = sshll.u32 %s794_s11, 4 }
 0x23e   : > { %796 = vsyncadd %s783_s16, %s795_s18  ;;  %p966_p13 = scmp.ne.s32.totalorder %s1729_s27, 0  ;;  %s798_s10 = scalar_lea.hbm %s1707_s5, %s965_s14 }
 0x23f   : > { %s799_s24 = sshll.u32 %s1729_s27, 4  ;;  %s800_s4 = sshll.u32 %s272_s15, 4  ;;  %s1662_s4 = int_to_ptr.vmem [resolvable:$true] %s800_s4 }
 0x240   : > { %s802_s12 = sshll.u32 %s798_s10, 4  ;;  %s1194_s13 = sshra.s32 %s1662_s4, 4  ;;  %s803_s12 = int_to_ptr.hbm [resolvable:$true] %s802_s12  ;;  %s1195_s13 = int_to_ptr.vmem [resolvable:$true] %s1194_s13 }
 0x241   : > { %s1196_s30 = sshrl.u32 %s799_s24, 4  ;;  %s1284_s19 = smov [#allocation8]  }
 0x242   : > { %s1201_s8 = scalar_lea.vmem %s1195_s13, %s1196_s30  ;;  %s1205_s9 = scalar_lea.vmem %s1284_s19, 4 }
 0x243   : > { %p1202_p11 = scmp.ne.s32.totalorder %s1195_s13, %s1201_s8  ;;  %p1207_p9 = scmp.lt.s32.totalorder %s1205_s9, %s1201_s8 }
 0x245   : > { %p1203_p2 = pnand %p1202_p11, %p966_p13 }
 0x247   : > { %p1204_p5 = pneg %p1203_p2 }
 0x249   : > { %p1209_p10 = pnand %p1207_p9, %p1204_p5 }
 0x24b   : > { %1212 = shalt.err (!%p1209_p10)
}
 0x24c   : > { %s1213_s29 = sshra.s32 %s803_s12, 4  ;;  %s1224_s18 = scalar_lea.hbm %s1707_s5, 3  ;;  %s1214_s29 = int_to_ptr.hbm [resolvable:$true] %s1213_s29 }
 0x24d   : > { %s1220_s15 = scalar_lea.hbm %s1214_s29, %s1196_s30  ;;  %p1225_p7 = scmp.lt.s32.totalorder %s1214_s29, %s1707_s5 }
 0x24e   : > { %p1221_p1 = scmp.ne.s32.totalorder %s1214_s29, %s1220_s15  ;;  %p1226_p8 = scmp.lt.s32.totalorder %s1224_s18, %s1220_s15 }
 0x250   : > { %p1222_p0 = pnand %p1221_p1, %p966_p13  ;;  %p1227_p4 = por %p1226_p8, %p1225_p7 }
 0x252   : > { %p1223_p3 = pneg %p1222_p0 }
 0x254   : > { %p1228_p12 = pnand %p1227_p4, %p1223_p3 }
 0x256   : > { %1231 = shalt.err (!%p1228_p12)
}
 0x257   : > { %805 = dma.vmem_to_hbm [thread:$0]  (%p966_p13), %s1662_s4, %s799_s24, %s803_s12, %s783_s16  }
 0x258 PF: > { %s814_s10 = sand.u32 1, %s1263_s20   ;;  %p1720_p6 = scmp.ne.s32.totalorder %s1714_s7, 0 }
 0x259   : > { %p1721_p11 = scmp.ge.s32.totalorder %s1275_s23, 2  ;;  %s815_s13 = scalar_lea.sflag [#allocation5], %s814_s10 }
 0x25b   : > { %p1015_p2 = pnand %p1721_p11, %p1720_p6 }
 0x25d   : > { %p1016_p5 = pneg %p1015_p2 }
 0x25f   : > { %1258 = dma.done.wait (%p1016_p5), %s815_s13, 32  }
 0x260   : > { %1260 = vsyncadd (%p1016_p5), %s815_s13, 4294967264  ;;  %p21_p9 = scmp.ge.s32.totalorder %s1343_s25, 4   ;;  %s1722_s20 = smov %s1267_s21 }
 0x261   : > { %s1723_s21 = smov %s1271_s22  ;;  %s1724_s22 = smov %s1355_s28 }
 0x262   : > { %s1725_s23 = smov %s1343_s25  ;;  %23 = sbr.rel (!%p21_p9) target bundleno = 9 (0x9), region = 89 }
 0x267   :  { %821 = vsyncpa [#allocation4], 1 }
 0x268   :  { %823 = vsyncpa [#allocation4 + $0x1], 1 }
 0x269   :  { %824 = vsyncpa [#allocation7], 1 }
 0x26a   :  { %825 = vsyncpa [#allocation5], 1 }
 0x26b   :  { %827 = vsyncpa [#allocation5 + $0x1], 1 }

</bundles_post_ra>
